<compile_context>
chip_gen: v5e
topology: v5e:2x2
jax: 0.10.0
libtpu: 0.0.40
codegen_flags: <defaults>
</compile_context>

<pallas_src>
import functools

import jax
import jax.numpy as jnp
from jax.experimental import pallas as pl
from jax.experimental.pallas import tpu as pltpu


def _round_up(x, m):
    return ((x + m - 1) // m) * m


def _fused_mlp_kernel(*refs, num_layers, act_dtype=None):
    """tanh(x) -> [matmul + bias + tanh] * (L-1) -> matmul + bias (fused)."""
    x_ref = refs[0]
    o_ref = refs[-1]
    wb_refs = refs[1:-1]  # (w0, b0, w1, b1, ..., w_{L-1}, b_{L-1})

    x = jnp.tanh(x_ref[...])
    for l in range(num_layers):
        w = wb_refs[2 * l][...]
        b = wb_refs[2 * l + 1][...]
        if act_dtype is not None:
            # Optional (v6e/v7x): feed the MXU/EUP with bf16, accumulate in f32.
            x = x.astype(act_dtype)
            w = w.astype(act_dtype)
        y = jnp.dot(x, w, preferred_element_type=jnp.float32) + b
        x = jnp.tanh(y) if l < num_layers - 1 else y
    o_ref[...] = x.astype(o_ref.dtype)


def prepare_params(params):
    """ONE-TIME preprocessing: zero-pad every feature dim to a 128-lane multiple.

    Weights are stored pre-transposed as [in, out]; padding is exact because
    tanh(0)=0 and zero rows/cols/bias lanes contribute nothing.
    Returns a flat tuple (w0, b0, w1, b1, ...) of lane-dense arrays.
    """
    flat = []
    for w, b in params:
        din, dout = w.shape
        din_pad = _round_up(max(din, 128), 128)
        dout_pad = _round_up(max(dout, 128), 128)
        w = jnp.pad(w, ((0, din_pad - din), (0, dout_pad - dout)))
        b = jnp.pad(b, ((0, 0), (0, dout_pad - dout)))
        flat.append(jnp.asarray(w, jnp.float32))
        flat.append(jnp.asarray(b, jnp.float32))
    return tuple(flat)


@functools.partial(jax.jit, static_argnames=("out_dim", "act_dtype"))
def net_forward(flat_params, x, out_dim, act_dtype=None):
    """Pallas implementation of Net.forward (single fused pallas_call).

    `flat_params` must come from `prepare_params` (lane-padded, [in, out]).
    """
    num_layers = len(flat_params) // 2
    batch, in_dim = x.shape
    in_pad = flat_params[0].shape[0]
    out_pad = flat_params[-1].shape[1]

    # Batch tiling: big tiles to amortize per-step overhead, but >=2 grid
    # steps when the batch allows so v7x's second TensorCore gets work via
    # the "parallel" axis.  tb is a multiple of 8 (f32 sublane).
    if batch >= 16:
        tb = min(1024, _round_up(pl.cdiv(batch, 2), 8))
    else:
        tb = _round_up(max(batch, 8), 8)
    batch_pad = _round_up(batch, tb)
    grid = (batch_pad // tb,)

    # Pad input: rows to the batch tile, features to the lane-padded in dim.
    x_p = jnp.pad(x, ((0, batch_pad - batch), (0, in_pad - in_dim)))

    # Advisory cost estimate for XLA's scheduler.
    flops = 0
    transcendentals = batch_pad * in_pad
    bytes_accessed = x_p.size * 4 + batch_pad * out_pad * 4
    for l in range(num_layers):
        w = flat_params[2 * l]
        b = flat_params[2 * l + 1]
        flops += 2 * batch_pad * w.shape[0] * w.shape[1]
        if l < num_layers - 1:
            transcendentals += batch_pad * w.shape[1]
        bytes_accessed += (w.size + b.size) * 4
    cost = pl.CostEstimate(
        flops=flops, transcendentals=transcendentals, bytes_accessed=bytes_accessed
    )

    in_specs = [pl.BlockSpec((tb, in_pad), lambda i: (i, 0))]
    for p in flat_params:
        in_specs.append(pl.BlockSpec(p.shape, lambda i: (0, 0)))

    kernel = functools.partial(
        _fused_mlp_kernel, num_layers=num_layers, act_dtype=act_dtype
    )

    out_padded = pl.pallas_call(
        kernel,
        out_shape=jax.ShapeDtypeStruct((batch_pad, out_pad), jnp.float32),
        grid=grid,
        in_specs=in_specs,
        out_specs=pl.BlockSpec((tb, out_pad), lambda i: (i, 0)),
        compiler_params=pltpu.CompilerParams(
            dimension_semantics=("parallel",),
        ),
        cost_estimate=cost,
    )(x_p, *flat_params)

    return out_padded[:batch, :out_dim]


def init_net_params(key, num_hidden, hidden_dim, output_dim):
    """Deterministic synthetic init (PyTorch-style uniform fan-in bound)."""
    dims_in = list(hidden_dim)
    dims_out = list(hidden_dim[1:]) + [output_dim]
    params = []
    for din, dout in zip(dims_in, dims_out):
        key, kw, kb = jax.random.split(key, 3)
        bound = 1.0 / jnp.sqrt(jnp.float32(din))
        # Stored as [in, out] (transpose of PyTorch's [out, in]).
        w = jax.random.uniform(kw, (din, dout), jnp.float32, -bound, bound)
        b = jax.random.uniform(kb, (1, dout), jnp.float32, -bound, bound)
        params.append((w, b))
    return params


def net_reference(params, x):
    """Pure-JAX reference for correctness check (unpadded params)."""
    x = jnp.tanh(x)
    for i, (w, b) in enumerate(params):
        x = x @ w + b
        if i != len(params) - 1:
            x = jnp.tanh(x)
    return x


if __name__ == "__main__":
    # Small shapes consistent with the module:
    #   num_hidden = 3, hidden_dim = [32, 32, 32], output_dim = 16
    num_hidden = 3
    hidden_dim = [32, 32, 32]
    output_dim = 16

    key = jax.random.PRNGKey(0)
    key, kx1, kx2 = jax.random.split(key, 3)

    params = init_net_params(key, num_hidden, hidden_dim, output_dim)
    flat_params = prepare_params(params)  # one-time, outside the jitted path

    # Case 1: tiny batch (single grid step).
    x1 = jax.random.normal(kx1, (8, hidden_dim[0]), jnp.float32)
    out1 = jax.block_until_ready(net_forward(flat_params, x1, output_dim))
    ref1 = net_reference(params, x1)
    assert out1.shape == (8, output_dim), out1.shape
    assert jnp.allclose(out1, ref1, atol=1e-5, rtol=1e-5), "mismatch (batch=8)"

    # Case 2: larger batch exercising the multi-tile "parallel" grid path.
    x2 = jax.random.normal(kx2, (64, hidden_dim[0]), jnp.float32)
    out2 = jax.block_until_ready(net_forward(flat_params, x2, output_dim))
    ref2 = net_reference(params, x2)
    assert out2.shape == (64, output_dim), out2.shape
    assert jnp.allclose(out2, ref2, atol=1e-5, rtol=1e-5), "mismatch (batch=64)"

    print("KERNEL_OK")
</pallas_src>

<mosaic_0001>
module attributes {stable_mosaic.version = 11 : i64} {
  func.func @_fused_mlp_kernel(%arg0: i32, %arg1: memref<8x128xf32, #tpu.memory_space<vmem>>, %arg2: memref<128x128xf32, #tpu.memory_space<vmem>>, %arg3: memref<1x128xf32, #tpu.memory_space<vmem>>, %arg4: memref<128x128xf32, #tpu.memory_space<vmem>>, %arg5: memref<1x128xf32, #tpu.memory_space<vmem>>, %arg6: memref<128x128xf32, #tpu.memory_space<vmem>>, %arg7: memref<1x128xf32, #tpu.memory_space<vmem>>, %arg8: memref<8x128xf32, #tpu.memory_space<vmem>>) attributes {dimension_semantics = [#tpu.dimension_semantics<parallel>], iteration_bounds = array<i64: 1>, scalar_prefetch = 0 : i64, scratch_operands = 0 : i64, tpu.core_type = #tpu.core_type<tc>, window_params = [{transform_indices = @transform_0, window_bounds = array<i64: 8, 128>}, {pipeline_mode = #tpu.pipeline_mode<synchronous>, transform_indices = @transform_1, window_bounds = array<i64: 128, 128>}, {pipeline_mode = #tpu.pipeline_mode<synchronous>, transform_indices = @transform_2, window_bounds = array<i64: 1, 128>}, {pipeline_mode = #tpu.pipeline_mode<synchronous>, transform_indices = @transform_3, window_bounds = array<i64: 128, 128>}, {pipeline_mode = #tpu.pipeline_mode<synchronous>, transform_indices = @transform_4, window_bounds = array<i64: 1, 128>}, {pipeline_mode = #tpu.pipeline_mode<synchronous>, transform_indices = @transform_5, window_bounds = array<i64: 128, 128>}, {pipeline_mode = #tpu.pipeline_mode<synchronous>, transform_indices = @transform_6, window_bounds = array<i64: 1, 128>}, {transform_indices = @transform_7, window_bounds = array<i64: 8, 128>}]} {
    %c0 = arith.constant 0 : index
    %c0_0 = arith.constant 0 : index
    %0 = vector.load %arg1[%c0, %c0_0] : memref<8x128xf32, #tpu.memory_space<vmem>>, vector<8x128xf32>
    %1 = math.tanh %0 : vector<8x128xf32>
    %c0_1 = arith.constant 0 : index
    %c0_2 = arith.constant 0 : index
    %2 = vector.load %arg2[%c0_1, %c0_2] : memref<128x128xf32, #tpu.memory_space<vmem>>, vector<128x128xf32>
    %c0_3 = arith.constant 0 : index
    %c0_4 = arith.constant 0 : index
    %3 = vector.load %arg3[%c0_3, %c0_4] : memref<1x128xf32, #tpu.memory_space<vmem>>, vector<1x128xf32>
    %cst = arith.constant dense<0.000000e+00> : vector<8x128xf32>
    %4 = tpu.matmul %1, %2, %cst {dimension_numbers = #tpu.dot_dimension_numbers<[1], [0], [0], [1], [0, 0, 1, 1], [], []>} : vector<8x128xf32>, vector<128x128xf32>, vector<8x128xf32> -> vector<8x128xf32>
    %5 = vector.broadcast %3 : vector<1x128xf32> to vector<8x128xf32>
    %6 = arith.addf %4, %5 : vector<8x128xf32>
    %7 = math.tanh %6 : vector<8x128xf32>
    %c0_5 = arith.constant 0 : index
    %c0_6 = arith.constant 0 : index
    %8 = vector.load %arg4[%c0_5, %c0_6] : memref<128x128xf32, #tpu.memory_space<vmem>>, vector<128x128xf32>
    %c0_7 = arith.constant 0 : index
    %c0_8 = arith.constant 0 : index
    %9 = vector.load %arg5[%c0_7, %c0_8] : memref<1x128xf32, #tpu.memory_space<vmem>>, vector<1x128xf32>
    %cst_9 = arith.constant dense<0.000000e+00> : vector<8x128xf32>
    %10 = tpu.matmul %7, %8, %cst_9 {dimension_numbers = #tpu.dot_dimension_numbers<[1], [0], [0], [1], [0, 0, 1, 1], [], []>} : vector<8x128xf32>, vector<128x128xf32>, vector<8x128xf32> -> vector<8x128xf32>
    %11 = vector.broadcast %9 : vector<1x128xf32> to vector<8x128xf32>
    %12 = arith.addf %10, %11 : vector<8x128xf32>
    %13 = math.tanh %12 : vector<8x128xf32>
    %c0_10 = arith.constant 0 : index
    %c0_11 = arith.constant 0 : index
    %14 = vector.load %arg6[%c0_10, %c0_11] : memref<128x128xf32, #tpu.memory_space<vmem>>, vector<128x128xf32>
    %c0_12 = arith.constant 0 : index
    %c0_13 = arith.constant 0 : index
    %15 = vector.load %arg7[%c0_12, %c0_13] : memref<1x128xf32, #tpu.memory_space<vmem>>, vector<1x128xf32>
    %cst_14 = arith.constant dense<0.000000e+00> : vector<8x128xf32>
    %16 = tpu.matmul %13, %14, %cst_14 {dimension_numbers = #tpu.dot_dimension_numbers<[1], [0], [0], [1], [0, 0, 1, 1], [], []>} : vector<8x128xf32>, vector<128x128xf32>, vector<8x128xf32> -> vector<8x128xf32>
    %17 = vector.broadcast %15 : vector<1x128xf32> to vector<8x128xf32>
    %18 = arith.addf %16, %17 : vector<8x128xf32>
    %c0_15 = arith.constant 0 : index
    %c0_16 = arith.constant 0 : index
    %19 = vector.load %arg8[%c0_15, %c0_16] : memref<8x128xf32, #tpu.memory_space<vmem>>, vector<8x128xf32>
    tpu.vector_store %arg8[%c0_15, %c0_16], %18 {strides = array<i32>} : memref<8x128xf32, #tpu.memory_space<vmem>>, vector<8x128xf32>,
    return
  }
  func.func @transform_0(%arg0: i32) -> (i32, i32) {
    %c0_i32 = arith.constant 0 : i32
    %c0_i32_0 = arith.constant 0 : i32
    return %arg0, %c0_i32 : i32, i32
  }
  func.func @transform_1(%arg0: i32) -> (i32, i32) {
    %c0_i32 = arith.constant 0 : i32
    %c0_i32_0 = arith.constant 0 : i32
    %c0_i32_1 = arith.constant 0 : i32
    return %c0_i32, %c0_i32_0 : i32, i32
  }
  func.func @transform_2(%arg0: i32) -> (i32, i32) {
    %c0_i32 = arith.constant 0 : i32
    %c0_i32_0 = arith.constant 0 : i32
    %c0_i32_1 = arith.constant 0 : i32
    return %c0_i32, %c0_i32_0 : i32, i32
  }
  func.func @transform_3(%arg0: i32) -> (i32, i32) {
    %c0_i32 = arith.constant 0 : i32
    %c0_i32_0 = arith.constant 0 : i32
    %c0_i32_1 = arith.constant 0 : i32
    return %c0_i32, %c0_i32_0 : i32, i32
  }
  func.func @transform_4(%arg0: i32) -> (i32, i32) {
    %c0_i32 = arith.constant 0 : i32
    %c0_i32_0 = arith.constant 0 : i32
    %c0_i32_1 = arith.constant 0 : i32
    return %c0_i32, %c0_i32_0 : i32, i32
  }
  func.func @transform_5(%arg0: i32) -> (i32, i32) {
    %c0_i32 = arith.constant 0 : i32
    %c0_i32_0 = arith.constant 0 : i32
    %c0_i32_1 = arith.constant 0 : i32
    return %c0_i32, %c0_i32_0 : i32, i32
  }
  func.func @transform_6(%arg0: i32) -> (i32, i32) {
    %c0_i32 = arith.constant 0 : i32
    %c0_i32_0 = arith.constant 0 : i32
    %c0_i32_1 = arith.constant 0 : i32
    return %c0_i32, %c0_i32_0 : i32, i32
  }
  func.func @transform_7(%arg0: i32) -> (i32, i32) {
    %c0_i32 = arith.constant 0 : i32
    %c0_i32_0 = arith.constant 0 : i32
    return %arg0, %c0_i32 : i32, i32
  }
}

</mosaic_0001>

<bundles_post_ra>
// kernel: net_forward.1
= control target key start
LH: loop header
LB: loop body
LE: loop exit
PB: predicated region body
PF: predicated region fallthrough
CT: control target
= control target key end

     0   :  { %12 = vsyncpa [#allocation3], 0  ;;  %s404_s0 = inlined_call_operand.vmem [shape: f32[8,128], index: 0, kind: input, shape index: {}]   ;;  %s405_s1 = inlined_call_operand.hbm [shape: f32[128,128], index: 1, kind: input, shape index: {}]   ;;  %s406_s2 = inlined_call_operand.vmem [shape: f32[1,128], index: 2, kind: input, shape index: {}]   ;;  %s407_s3 = inlined_call_operand.hbm [shape: f32[128,128], index: 3, kind: input, shape index: {}]   ;;  %s408_s4 = inlined_call_operand.vmem [shape: f32[1,128], index: 4, kind: input, shape index: {}]   ;;  %s409_s5 = inlined_call_operand.hbm [shape: f32[128,128], index: 5, kind: input, shape index: {}]   ;;  %s410_s6 = inlined_call_operand.vmem [shape: f32[1,128], index: 6, kind: input, shape index: {}]   ;;  %s411_s7 = inlined_call_operand.hbm [shape: f32[8,128], index: 7, kind: output, shape index: {}]  }
   0x1   :  { %13 = vsyncpa [#allocation6], 0 }
   0x2   :  { %14 = vsyncpa [#allocation4], 0  ;;  %s36_s26 = sshll.u32 %s407_s3, 4  ;;  %s334_s27 = smov [#allocation5]   ;;  %s37_s26 = int_to_ptr.hbm [resolvable:$true] %s36_s26 }
   0x3   :  { %s38_s28 = sshll.u32 %s334_s27, 4  ;;  %s21_s8 = sshll.u32 %s405_s1, 4  ;;  %s39_s28 = int_to_ptr.vmem [resolvable:$true] %s38_s28  ;;  %s22_s8 = int_to_ptr.hbm [resolvable:$true] %s21_s8 }
   0x4   :  { %s335_s9 = smov 128   ;;  %s336_s10 = smov 8  }
   0x5   :  { %44 = dma.hbm_to_vmem [thread:$0]  %s37_s26, 2048, %s39_s28, [#allocation6], %s335_s9, %s335_s9, %s336_s10  }
   0x6   :  { %s337_s11 = smov [#allocation2]   ;;  %s51_s15 = sshll.u32 %s409_s5, 4  ;;  %s52_s15 = int_to_ptr.hbm [resolvable:$true] %s51_s15 }
   0x7   :  { %s23_s12 = sshll.u32 %s337_s11, 4  ;;  %s338_s3 = smov [#allocation7]   ;;  %s24_s12 = int_to_ptr.vmem [resolvable:$true] %s23_s12 }
   0x8   :  { %29 = dma.hbm_to_vmem [thread:$0]  %s22_s8, 2048, %s24_s12, [#allocation3], %s335_s9, %s335_s9, %s336_s10  }
   0x9   :  { %s53_s16 = sshll.u32 %s338_s3, 4  ;;  %s54_s16 = int_to_ptr.vmem [resolvable:$true] %s53_s16 }
   0xa   :  { %59 = dma.hbm_to_vmem [thread:$0]  %s52_s15, 2048, %s54_s16, [#allocation6], %s335_s9, %s335_s9, %s336_s10  }
   0xb   :  { %328 = dma.done.wait [#allocation3], 2048  }
   0xc   :  { %329 = vsyncadd [#allocation3], 4294965248 }
   0xd   :  { %330 = dma.done.wait [#allocation6], 4096  }
   0xe   :  { %331 = vsyncadd [#allocation6], 4294963200  ;;  %v91_v0 = vld [vmem:[#allocation2 + $0x78] sm:$0xff]  ;;  %v90_v1 = vld [vmem:[#allocation2 + $0x70] sm:$0xff]  ;;  %s339_s21 = smov [#allocation8]   ;;  %s206_s25 = sshll.u32 %s411_s7, 4  ;;  %s207_s25 = int_to_ptr.hbm [resolvable:$true] %s206_s25 }
   0xf   :  { %96 = vmatpush.msra.mxu0 %v91_v0  ;;  %v89_v2 = vld [vmem:[#allocation2 + $0x68] sm:$0xff]  ;;  %v88_v3 = vld [vmem:[#allocation2 + $0x60] sm:$0xff]  ;;  %v132_v4 = vld [vmem:[#allocation5 + $0x78] sm:$0xff]  ;;  %s204_s22 = sshll.u32 %s339_s21, 4  ;;  %s205_s22 = int_to_ptr.vmem [resolvable:$true] %s204_s22 }
  0x10   :  { %v87_v5 = vld [vmem:[#allocation2 + $0x58] sm:$0xff]  ;;  %137 = vmatpush.msra.mxu1 %v132_v4  ;;  %v131_v6 = vld [vmem:[#allocation5 + $0x70] sm:$0xff]  ;;  %v130_v7 = vld [vmem:[#allocation5 + $0x68] sm:$0xff] }
  0x11   :  { %97 = vmatpush.msra.mxu0 %v90_v1  ;;  %v86_v8 = vld [vmem:[#allocation2 + $0x50] sm:$0xff]  ;;  %v129_v9 = vld [vmem:[#allocation5 + $0x60] sm:$0xff]  ;;  %v85_v10 = vld [vmem:[#allocation2 + $0x48] sm:$0xff] }
  0x12   :  { %138 = vmatpush.msra.mxu1 %v131_v6  ;;  %v128_v11 = vld [vmem:[#allocation5 + $0x58] sm:$0xff]  ;;  %v84_v12 = vld [vmem:[#allocation2 + $0x40] sm:$0xff]  ;;  %v127_v13 = vld [vmem:[#allocation5 + $0x50] sm:$0xff] }
  0x13   :  { %98 = vmatpush.msra.mxu0 %v89_v2  ;;  %v83_v14 = vld [vmem:[#allocation2 + $0x38] sm:$0xff]  ;;  %v126_v15 = vld [vmem:[#allocation5 + $0x48] sm:$0xff]  ;;  %v82_v16 = vld [vmem:[#allocation2 + $0x30] sm:$0xff] }
  0x14   :  { %139 = vmatpush.msra.mxu1 %v130_v7  ;;  %v125_v17 = vld [vmem:[#allocation5 + $0x40] sm:$0xff]  ;;  %v81_v18 = vld [vmem:[#allocation2 + $0x28] sm:$0xff]  ;;  %v124_v19 = vld [vmem:[#allocation5 + $0x38] sm:$0xff] }
  0x15   :  { %99 = vmatpush.msra.mxu0 %v88_v3  ;;  %v80_v20 = vld [vmem:[#allocation2 + $0x20] sm:$0xff]  ;;  %v123_v22 = vld [vmem:[#allocation5 + $0x30] sm:$0xff]  ;;  %v79_v23 = vld [vmem:[#allocation2 + $0x18] sm:$0xff] }
  0x16   :  { %140 = vmatpush.msra.mxu1 %v129_v9  ;;  %v74_v21 = vld [vmem:[%s404_s0] sm:$0xff]  ;;  %v122_v24 = vld [vmem:[#allocation5 + $0x28] sm:$0xff]  ;;  %v78_v25 = vld [vmem:[#allocation2 + $0x10] sm:$0xff] }
  0x17   :  { %100 = vmatpush.msra.mxu0 %v87_v5  ;;  %226 = vtanh.f32 %v74_v21  ;;  %v77_v26 = vld [vmem:[#allocation2 + $0x8] sm:$0xff]  ;;  %v76_v27 = vld [vmem:[#allocation2] sm:$0xff]  ;;  %v120_v30 = vld [vmem:[#allocation5 + $0x18] sm:$0xff] }
  0x18   :  { %141 = vmatpush.msra.mxu1 %v128_v11  ;;  %v121_v29 = vld [vmem:[#allocation5 + $0x20] sm:$0xff]  ;;  %v119_v31 = vld [vmem:[#allocation5 + $0x10] sm:$0xff]  ;;  %v118_v32 = vld [vmem:[#allocation5 + $0x8] sm:$0xff] }
  0x19   :  { %101 = vmatpush.msra.mxu0 %v86_v8  ;;  %v117_v33 = vld [vmem:[#allocation5] sm:$0xff]  ;;  %v173_v34 = vld [vmem:[#allocation7 + $0x78] sm:$0xff]  ;;  %v172_v35 = vld [vmem:[#allocation7 + $0x70] sm:$0xff] }
  0x1a   :  { %142 = vmatpush.msra.mxu1 %v127_v13  ;;  %178 = vmatpush.msra.mxu2 %v173_v34  ;;  %v171_v36 = vld [vmem:[#allocation7 + $0x68] sm:$0xff]  ;;  %v170_v37 = vld [vmem:[#allocation7 + $0x60] sm:$0xff]  ;;  %v169_v38 = vld [vmem:[#allocation7 + $0x58] sm:$0xff] }
  0x1b   :  { %102 = vmatpush.msra.mxu0 %v85_v10  ;;  %v168_v39 = vld [vmem:[#allocation7 + $0x50] sm:$0xff]  ;;  %v167_v40 = vld [vmem:[#allocation7 + $0x48] sm:$0xff]  ;;  %v166_v41 = vld [vmem:[#allocation7 + $0x40] sm:$0xff] }
  0x1c   :  { %143 = vmatpush.msra.mxu1 %v126_v15  ;;  %179 = vmatpush.msra.mxu2 %v172_v35  ;;  %v165_v42 = vld [vmem:[#allocation7 + $0x38] sm:$0xff]  ;;  %v164_v43 = vld [vmem:[#allocation7 + $0x30] sm:$0xff]  ;;  %v163_v44 = vld [vmem:[#allocation7 + $0x28] sm:$0xff] }
  0x1d   :  { %103 = vmatpush.msra.mxu0 %v84_v12  ;;  %v227_v28 = vpop.eup %226  ;;  %v223_v45 = vld [vmem:[%s406_s2] ss:$0 sm:$0xff]  ;;  %v161_v50 = vld [vmem:[#allocation7 + $0x18] sm:$0xff]  ;;  %v160_v51 = vld [vmem:[#allocation7 + $0x10] sm:$0xff] }
  0x1e   :  { %144 = vmatpush.msra.mxu1 %v125_v17  ;;  %180 = vmatpush.msra.mxu2 %v171_v36  ;;  %v162_v49 = vld [vmem:[#allocation7 + $0x20] sm:$0xff]  ;;  %v159_v52 = vld [vmem:[#allocation7 + $0x8] sm:$0xff] }
  0x1f   :  { %104 = vmatpush.msra.mxu0 %v83_v14  ;;  %v158_v53 = vld [vmem:[#allocation7] sm:$0xff] }
  0x20   :  { %145 = vmatpush.msra.mxu1 %v124_v19  ;;  %181 = vmatpush.msra.mxu2 %v170_v37  ;;  %v224_v54 = vld [vmem:[%s408_s4] ss:$0 sm:$0xff] }
  0x21   :  { %105 = vmatpush.msra.mxu0 %v82_v16  ;;  %v225_v58 = vld [vmem:[%s410_s6] ss:$0 sm:$0xff] }
  0x22   :  { %146 = vmatpush.msra.mxu1 %v123_v22  ;;  %182 = vmatpush.msra.mxu2 %v169_v38 }
  0x23   :  { %106 = vmatpush.msra.mxu0 %v81_v18 }
  0x24   :  { %147 = vmatpush.msra.mxu1 %v122_v24  ;;  %183 = vmatpush.msra.mxu2 %v168_v39 }
  0x25   :  { %107 = vmatpush.msra.mxu0 %v80_v20 }
  0x26   :  { %148 = vmatpush.msra.mxu1 %v121_v29  ;;  %184 = vmatpush.msra.mxu2 %v167_v40 }
  0x27   :  { %108 = vmatpush.msra.mxu0 %v79_v23 }
  0x28   :  { %149 = vmatpush.msra.mxu1 %v120_v30  ;;  %185 = vmatpush.msra.mxu2 %v166_v41 }
  0x29   :  { %109 = vmatpush.msra.mxu0 %v78_v25 }
  0x2a   :  { %150 = vmatpush.msra.mxu1 %v119_v31  ;;  %186 = vmatpush.msra.mxu2 %v165_v42 }
  0x2b   :  { %110 = vmatpush.msra.mxu0 %v77_v26 }
  0x2c   :  { %151 = vmatpush.msra.mxu1 %v118_v32  ;;  %187 = vmatpush.msra.mxu2 %v164_v43 }
  0x2d   :  { %111 = vmatpush.msra.mxu0 %v76_v27 }
  0x2e   :  { %112 = vmatmul.f32.vlgmr.msra.gmra.mxu0 %v227_v28  ;;  %152 = vmatpush.msra.mxu1 %v117_v33 }
  0x2f   :  { %188 = vmatpush.msra.mxu2 %v163_v44 }
  0x31   :  { %189 = vmatpush.msra.mxu2 %v162_v49 }
  0x33   :  { %190 = vmatpush.msra.mxu2 %v161_v50 }
  0x35   :  { %191 = vmatpush.msra.mxu2 %v160_v51 }
  0x37   :  { %192 = vmatpush.msra.mxu2 %v159_v52 }
  0x39   :  { %193 = vmatpush.msra.mxu2 %v158_v53 }
  0xab   :  { %v113_v46 = vpop.f32.mrf.mxu0 }
  0xac   :  { %v114_v47 = vadd.f32 %v223_v45, %v113_v46 }
  0xae   :  { %228 = vtanh.f32 %v114_v47 }
  0xb4   :  { %v229_v48 = vpop.eup %228 }
  0xb5   :  { %153 = vmatmul.f32.vlgmr.msra.gmra.mxu1 %v229_v48 }
 0x132   :  { %v154_v55 = vpop.f32.mrf.mxu1 }
 0x133   :  { %v155_v56 = vadd.f32 %v224_v54, %v154_v55 }
 0x135   :  { %230 = vtanh.f32 %v155_v56 }
 0x13b   :  { %v231_v57 = vpop.eup %230 }
 0x13c   :  { %194 = vmatmul.f32.vlgmr.msra.gmra.mxu2 %v231_v57 }
 0x1bf   :  { %v195_v59 = vpop.f32.mrf.mxu2 }
 0x1c0   :  { %v196_v60 = vadd.f32 %v225_v58, %v195_v59 }
 0x1c2   :  { %198 = vst [vmem:[#allocation8] sm:$0xff] %v196_v60 }
 0x1c3   :  { %209 = dma.vmem_to_hbm [thread:$0]  %s205_s22, 128, %s207_s25, [#allocation4]  }
 0x1c4   :  { %332 = dma.done.wait [#allocation4], 128  }
 0x1c5   :  { %333 = vsyncadd [#allocation4], 4294967168 }
 0x1c6   :  { %214 = vsyncpa [#allocation3], 1 }
 0x1c7   :  { %215 = vsyncpa [#allocation6], 1 }
 0x1c8   :  { %216 = vsyncpa [#allocation4], 1 }

</bundles_post_ra>
